<compile_context>
chip_gen: v7x
topology: tpu7x:2x2x1
jax: 0.10.0
libtpu: 0.0.40
codegen_flags: <defaults>
</compile_context>

<pallas_src>
import functools

import jax
import jax.numpy as jnp
from jax.experimental import pallas as pl
from jax.experimental.pallas import tpu as pltpu


# ----------------------------------------------------------------------------
# Weight-slab layout (bf16).  Row offsets are multiples of 8; every ref column
# slice used in the kernel is a multiple of 128.
# ----------------------------------------------------------------------------
R_F1 = 0      # fused (value_proj -> out_proj -> fc1): (32, 256)
R_FC2 = 32    # fc2: (256, 128)
R_GRU = 288   # packed GRU gates [r|z|n], each [fwd|bwd]: (128, 384)
R_TAIL = 416  # tail band (128, 384): cols 0:128 fc3 (padded), 128:256 fc4 (padded)
R_HEAD = 544  # output head, transposed + padded: (8, 128), row 0 real
R_END = 552
W_COLS = 384

# Bias-slab rows (f32, (8, 384)).
BR_F1, BR_FC2, BR_GRU, BR_NH, BR_FC3, BR_FC4, BR_OUT = 0, 1, 2, 3, 4, 5, 6
B_ROWS = 8


# ----------------------------------------------------------------------------
# Pallas kernel: whole forward pass for one (TM, 32) batch tile.
# ----------------------------------------------------------------------------
def jamba_kernel(x_ref, w_ref, b_ref, out_ref):
    f32 = jnp.float32
    bf16 = jnp.bfloat16

    x = x_ref[...]                      # (TM, 32) bf16
    b = b_ref[...]                      # (8, 384) f32 bias slab (tiny, load once)

    # Attention (seq_len == 1) fused offline with fc1; ReLU in f32.
    h = jnp.dot(x, w_ref[R_F1:R_FC2, 0:256], preferred_element_type=f32)
    h = jnp.maximum(h + b[BR_F1:BR_F1 + 1, 0:256], 0.0)            # (TM, 256) f32

    # fc2 + ReLU (dropout = identity in eval).
    h = jnp.dot(h.astype(bf16), w_ref[R_FC2:R_GRU, 0:128],
                preferred_element_type=f32)
    h = jnp.maximum(h + b[BR_FC2:BR_FC2 + 1, 0:128], 0.0)          # (TM, 128) f32

    # Bidirectional single-step GRU (h0 = 0), gates packed lane-dense:
    # cols [r_fwd|r_bwd | z_fwd|z_bwd | n_fwd|n_bwd].
    g = jnp.dot(h.astype(bf16), w_ref[R_GRU:R_TAIL, 0:384],
                preferred_element_type=f32)
    g = g + b[BR_GRU:BR_GRU + 1, 0:384]                            # (TM, 384) f32
    r = jax.nn.sigmoid(g[:, 0:128])
    z = jax.nn.sigmoid(g[:, 128:256])
    n = jnp.tanh(g[:, 256:384] + r * b[BR_NH:BR_NH + 1, 0:128])
    h_gru = (1.0 - z) * n               # (TM, 128) f32 == concat([h_fwd, h_bwd])

    # fc3 (zero-padded to 128 lanes) + ReLU.
    t = jnp.dot(h_gru.astype(bf16), w_ref[R_TAIL:R_HEAD, 0:128],
                preferred_element_type=f32)
    t = jnp.maximum(t + b[BR_FC3:BR_FC3 + 1, 0:128], 0.0)

    # fc4 (zero-padded) + ReLU.
    t = jnp.dot(t.astype(bf16), w_ref[R_TAIL:R_HEAD, 128:256],
                preferred_element_type=f32)
    t = jnp.maximum(t + b[BR_FC4:BR_FC4 + 1, 0:128], 0.0)

    # Output head, transposed: (8, 128) @ (TM, 128)^T -> (8, TM).
    # Only row 0 of the head weight (and hence of the result) is real; the
    # wrapper slices row 0.  This keeps the store lane-dense and shrinks the
    # HBM writeback from 512 B/row to 32 B/row.
    ot = jax.lax.dot_general(
        w_ref[R_HEAD:R_END, 0:128], t.astype(bf16),
        dimension_numbers=(((1,), (1,)), ((), ())),
        preferred_element_type=f32)                                # (8, TM)
    out_ref[...] = ot + b[BR_OUT:BR_OUT + 1, 0:1]


# ----------------------------------------------------------------------------
# Parameter construction (deterministic, mirrors nn.Module __init__ shapes).
# ----------------------------------------------------------------------------
def init_params(key, input_dim):
    D = input_dim            # embed_dim (Identity embedding: D % 4 == 0)
    ks = jax.random.split(key, 32)
    it = iter(ks)

    def dense(k, fan_in, fan_out):
        # PyTorch-style uniform(-1/sqrt(fan_in), 1/sqrt(fan_in)); stored
        # transposed to (in, out) so the kernel computes x @ W.
        bound = 1.0 / jnp.sqrt(jnp.float32(fan_in))
        w = jax.random.uniform(k, (fan_in, fan_out), jnp.float32, -bound, bound)
        b = jax.random.uniform(jax.random.fold_in(k, 1), (1, fan_out),
                               jnp.float32, -bound, bound)
        return w, b

    p = {}
    # MultiheadAttention: only value-proj + out-proj matter for seq_len == 1.
    p["wv"], p["bv"] = dense(next(it), D, D)
    p["wao"], p["bao"] = dense(next(it), D, D)
    # fc1, fc2
    p["w1"], p["b1"] = dense(next(it), D, 256)
    p["w2"], p["b2"] = dense(next(it), 256, 128)
    # GRU(128 -> 64, bidirectional).  Per-gate weights transposed to (128,64),
    # combined biases br = b_ir + b_hr, bz = b_iz + b_hz; bni = b_in, bnh = b_hn.
    bound = 1.0 / jnp.sqrt(64.0)
    for tag in ("f", "b"):
        for gate in ("r", "z", "n"):
            p[f"{tag}w{gate}"] = jax.random.uniform(
                next(it), (128, 64), jnp.float32, -bound, bound)
        bih = jax.random.uniform(next(it), (1, 192), jnp.float32, -bound, bound)
        bhh = jax.random.uniform(next(it), (1, 192), jnp.float32, -bound, bound)
        p[f"{tag}br"] = bih[:, 0:64] + bhh[:, 0:64]
        p[f"{tag}bz"] = bih[:, 64:128] + bhh[:, 64:128]
        p[f"{tag}bni"] = bih[:, 128:192]
        p[f"{tag}bnh"] = bhh[:, 128:192]
    # fc3, fc4, output head
    p["w3"], p["b3"] = dense(next(it), 128, 64)
    p["w4"], p["b4"] = dense(next(it), 64, 32)
    p["w5"], p["b5"] = dense(next(it), 32, 1)
    return p


def pack_params(p):
    """Offline fusion + packing into one bf16 weight slab and one f32 bias slab."""
    f32 = jnp.float32
    bf16 = jnp.bfloat16

    # Fuse attn(value->out_proj) with fc1 (no nonlinearity in between; exact
    # up to fp32 summation reorder).  Fusion math done in f32, cast bf16 once.
    w_f1 = p["wv"] @ p["wao"] @ p["w1"]                               # (32, 256)
    b_f1 = (p["bv"] @ p["wao"] + p["bao"]) @ p["w1"] + p["b1"]        # (1, 256)

    # Packed GRU gates: cols [r_fwd|r_bwd | z_fwd|z_bwd | n_fwd|n_bwd].
    w_gru = jnp.concatenate(
        [p["fwr"], p["bwr"], p["fwz"], p["bwz"], p["fwn"], p["bwn"]], axis=1)
    b_rzn = jnp.concatenate(
        [p["fbr"], p["bbr"], p["fbz"], p["bbz"], p["fbni"], p["bbni"]], axis=1)
    b_nh = jnp.concatenate([p["fbnh"], p["bbnh"]], axis=1)            # (1, 128)

    # Tail band (128, 384): [fc3_pad | fc4_pad | zero].  Padding is exact:
    # ReLU(0 + 0) = 0 and zero weight rows/cols contribute nothing.
    w3 = jnp.pad(p["w3"], ((0, 0), (0, 64)))          # (128, 128)
    w4 = jnp.pad(p["w4"], ((0, 64), (0, 96)))         # (128, 128)
    w_tail = jnp.concatenate([w3, w4, jnp.zeros((128, 128), f32)], axis=1)

    # Head band (8, 128): row 0 = output weight transposed, rows 1..7 zero.
    w_head = jnp.pad(p["w5"].T, ((0, 7), (0, 96)))    # (8, 128)

    def pad_cols(a):
        return jnp.pad(a, ((0, 0), (0, W_COLS - a.shape[1])))

    w_slab = jnp.concatenate(
        [pad_cols(w_f1), pad_cols(p["w2"]), w_gru, w_tail, pad_cols(w_head)],
        axis=0).astype(bf16)                          # (552, 384) bf16

    b3 = jnp.pad(p["b3"], ((0, 0), (0, 64)))
    b4 = jnp.pad(p["b4"], ((0, 0), (0, 96)))
    b5 = jnp.pad(p["b5"], ((0, 0), (0, 127)))
    b_slab = jnp.concatenate(
        [pad_cols(b_f1), pad_cols(p["b2"]), b_rzn, pad_cols(b_nh),
         pad_cols(b3), pad_cols(b4), pad_cols(b5),
         jnp.zeros((1, W_COLS), f32)], axis=0).astype(f32)   # (8, 384) f32

    assert w_slab.shape == (R_END, W_COLS)
    assert b_slab.shape == (B_ROWS, W_COLS)
    return w_slab, b_slab


# ----------------------------------------------------------------------------
# Pure-JAX f32 reference (same semantics), for tolerance validation of the
# offline fusion + bf16 MXU operands.
# ----------------------------------------------------------------------------
def reference_forward(x, p):
    x = x.astype(jnp.float32)
    a = (x @ p["wv"] + p["bv"]) @ p["wao"] + p["bao"]      # attention, seq_len=1
    h = jax.nn.relu(a @ p["w1"] + p["b1"])
    h = jax.nn.relu(h @ p["w2"] + p["b2"])
    outs = []
    for tag in ("f", "b"):                                  # GRU, one step, h0=0
        r = jax.nn.sigmoid(h @ p[f"{tag}wr"] + p[f"{tag}br"])
        z = jax.nn.sigmoid(h @ p[f"{tag}wz"] + p[f"{tag}bz"])
        n = jnp.tanh(h @ p[f"{tag}wn"] + p[f"{tag}bni"] + r * p[f"{tag}bnh"])
        outs.append((1.0 - z) * n)
    hg = jnp.concatenate(outs, axis=-1)
    t = jax.nn.relu(hg @ p["w3"] + p["b3"])
    t = jax.nn.relu(t @ p["w4"] + p["b4"])
    return t @ p["w5"] + p["b5"]


# ----------------------------------------------------------------------------
# Wrapper: batch grid (parallel), weights resident in VMEM across grid steps.
# ----------------------------------------------------------------------------
def _round_up(n, m):
    return (n + m - 1) // m * m


@functools.partial(jax.jit, static_argnames=("block_batch",))
def jamba_forward(x, w_slab, b_slab, *, block_batch=1024):
    B, D = x.shape
    x = x.astype(jnp.bfloat16)          # halve the x DMA; matmuls want bf16 anyway

    b16 = _round_up(B, 16)              # bf16 sublane packing = 16 rows
    if b16 <= 128:
        tm = b16                        # single grid step; block == full array
    else:
        # Lane-dense tiles (multiple of 128 -> unmasked output stores); cap the
        # tile so the grid has >= 2 steps and both v7x TensorCores get work.
        tm = min(block_batch, _round_up(-(-b16 // 2), 128))
    b_pad = _round_up(b16, tm)
    if b_pad != B:
        x = jnp.pad(x, ((0, b_pad - B), (0, 0)))

    out = pl.pallas_call(
        jamba_kernel,
        grid=(b_pad // tm,),
        out_shape=jax.ShapeDtypeStruct((8, b_pad), jnp.float32),
        in_specs=[
            pl.BlockSpec((tm, D), lambda i: (i, 0)),            # activations: pipelined
            pl.BlockSpec((R_END, W_COLS), lambda i: (0, 0)),    # weight slab: resident
            pl.BlockSpec((B_ROWS, W_COLS), lambda i: (0, 0)),   # bias slab: resident
        ],
        out_specs=pl.BlockSpec((8, tm), lambda i: (0, i)),      # narrow, lane-dense
        compiler_params=pltpu.CompilerParams(
            dimension_semantics=("parallel",),    # megacore / v7x dual-TC
            vmem_limit_bytes=32 << 20),           # actual footprint is a few MiB
    )(x, w_slab, b_slab)
    return out[0, :B].reshape(B, 1)


if __name__ == "__main__":
    INPUT_DIM = 32   # divisible by 4 -> Identity embedding, 4 heads

    key = jax.random.PRNGKey(0)
    k_x, k_x2, k_p = jax.random.split(key, 3)
    params = init_params(k_p, INPUT_DIM)
    w_slab, b_slab = pack_params(params)

    # Small batch (single grid step) and a larger one exercising tiling/padding.
    x_small = jax.random.normal(k_x, (8, INPUT_DIM), jnp.float32)
    x_large = jax.random.normal(k_x2, (384, INPUT_DIM), jnp.float32)

    ok = True
    for x in (x_small, x_large):
        out = jax.block_until_ready(jamba_forward(x, w_slab, b_slab))
        assert out.shape == (x.shape[0], 1), out.shape
        assert bool(jnp.all(jnp.isfinite(out)))
        ref = reference_forward(x, params)
        err = float(jnp.max(jnp.abs(out - ref)))
        ok = ok and (err < 3e-2)        # bf16 MXU + offline fusion tolerance
        assert ok, f"max abs err {err}"
    print("KERNEL_OK")
</pallas_src>

<mosaic_0001>
module attributes {stable_mosaic.version = 11 : i64} {
  func.func @jamba_kernel(%arg0: i32, %arg1: memref<16x32xbf16, #tpu.memory_space<vmem>>, %arg2: memref<552x384xbf16, #tpu.memory_space<vmem>>, %arg3: memref<8x384xf32, #tpu.memory_space<vmem>>, %arg4: memref<8x16xf32, #tpu.memory_space<vmem>>) attributes {dimension_semantics = [#tpu.dimension_semantics<parallel>], iteration_bounds = array<i64: 1>, scalar_prefetch = 0 : i64, scratch_operands = 0 : i64, tpu.core_type = #tpu.core_type<tc>, window_params = [{transform_indices = @transform_0, window_bounds = array<i64: 16, 32>}, {pipeline_mode = #tpu.pipeline_mode<synchronous>, transform_indices = @transform_1, window_bounds = array<i64: 552, 384>}, {pipeline_mode = #tpu.pipeline_mode<synchronous>, transform_indices = @transform_2, window_bounds = array<i64: 8, 384>}, {transform_indices = @transform_3, window_bounds = array<i64: 8, 16>}]} {
    %c0 = arith.constant 0 : index
    %c0_0 = arith.constant 0 : index
    %0 = vector.load %arg1[%c0, %c0_0] : memref<16x32xbf16, #tpu.memory_space<vmem>>, vector<16x32xbf16>
    %c0_1 = arith.constant 0 : index
    %c0_2 = arith.constant 0 : index
    %1 = vector.load %arg3[%c0_1, %c0_2] : memref<8x384xf32, #tpu.memory_space<vmem>>, vector<8x384xf32>
    %c0_3 = arith.constant 0 : index
    %c0_4 = arith.constant 0 : index
    %2 = vector.load %arg2[%c0_3, %c0_4] : memref<552x384xbf16, #tpu.memory_space<vmem>>, vector<32x256xbf16>
    %cst = arith.constant dense<0.000000e+00> : vector<16x256xf32>
    %3 = tpu.matmul %0, %2, %cst {dimension_numbers = #tpu.dot_dimension_numbers<[1], [0], [0], [1], [0, 0, 1, 1], [], []>} : vector<16x32xbf16>, vector<32x256xbf16>, vector<16x256xf32> -> vector<16x256xf32>
    %4 = vector.extract_strided_slice %1 {offsets = [0, 0], sizes = [1, 256], strides = [1, 1]} : vector<8x384xf32> to vector<1x256xf32>
    %5 = vector.broadcast %4 : vector<1x256xf32> to vector<16x256xf32>
    %6 = arith.addf %3, %5 : vector<16x256xf32>
    %cst_5 = arith.constant 0.000000e+00 : f32
    %7 = vector.broadcast %cst_5 : f32 to vector<16x256xf32>
    %8 = arith.maximumf %6, %7 : vector<16x256xf32>
    %9 = arith.truncf %8 : vector<16x256xf32> to vector<16x256xbf16>
    %c32 = arith.constant 32 : index
    %c0_6 = arith.constant 0 : index
    %10 = vector.load %arg2[%c32, %c0_6] : memref<552x384xbf16, #tpu.memory_space<vmem>>, vector<256x128xbf16>
    %cst_7 = arith.constant dense<0.000000e+00> : vector<16x128xf32>
    %11 = tpu.matmul %9, %10, %cst_7 {dimension_numbers = #tpu.dot_dimension_numbers<[1], [0], [0], [1], [0, 0, 1, 1], [], []>} : vector<16x256xbf16>, vector<256x128xbf16>, vector<16x128xf32> -> vector<16x128xf32>
    %12 = vector.extract_strided_slice %1 {offsets = [1, 0], sizes = [1, 128], strides = [1, 1]} : vector<8x384xf32> to vector<1x128xf32>
    %13 = vector.broadcast %12 : vector<1x128xf32> to vector<16x128xf32>
    %14 = arith.addf %11, %13 : vector<16x128xf32>
    %cst_8 = arith.constant 0.000000e+00 : f32
    %15 = vector.broadcast %cst_8 : f32 to vector<16x128xf32>
    %16 = arith.maximumf %14, %15 : vector<16x128xf32>
    %17 = arith.truncf %16 : vector<16x128xf32> to vector<16x128xbf16>
    %c288 = arith.constant 288 : index
    %c0_9 = arith.constant 0 : index
    %18 = vector.load %arg2[%c288, %c0_9] : memref<552x384xbf16, #tpu.memory_space<vmem>>, vector<128x384xbf16>
    %cst_10 = arith.constant dense<0.000000e+00> : vector<16x384xf32>
    %19 = tpu.matmul %17, %18, %cst_10 {dimension_numbers = #tpu.dot_dimension_numbers<[1], [0], [0], [1], [0, 0, 1, 1], [], []>} : vector<16x128xbf16>, vector<128x384xbf16>, vector<16x384xf32> -> vector<16x384xf32>
    %20 = vector.extract_strided_slice %1 {offsets = [2, 0], sizes = [1, 384], strides = [1, 1]} : vector<8x384xf32> to vector<1x384xf32>
    %21 = vector.broadcast %20 : vector<1x384xf32> to vector<16x384xf32>
    %22 = arith.addf %19, %21 : vector<16x384xf32>
    %23 = vector.extract_strided_slice %22 {offsets = [0, 0], sizes = [16, 128], strides = [1, 1]} : vector<16x384xf32> to vector<16x128xf32>
    %24 = arith.negf %23 : vector<16x128xf32>
    %25 = math.exp %24 : vector<16x128xf32>
    %cst_11 = arith.constant 1.000000e+00 : f32
    %26 = vector.broadcast %cst_11 : f32 to vector<16x128xf32>
    %27 = arith.addf %26, %25 : vector<16x128xf32>
    %28 = arith.divf %26, %27 : vector<16x128xf32>
    %29 = vector.extract_strided_slice %22 {offsets = [0, 128], sizes = [16, 128], strides = [1, 1]} : vector<16x384xf32> to vector<16x128xf32>
    %30 = arith.negf %29 : vector<16x128xf32>
    %31 = math.exp %30 : vector<16x128xf32>
    %cst_12 = arith.constant 1.000000e+00 : f32
    %32 = vector.broadcast %cst_12 : f32 to vector<16x128xf32>
    %33 = arith.addf %32, %31 : vector<16x128xf32>
    %34 = arith.divf %32, %33 : vector<16x128xf32>
    %35 = vector.extract_strided_slice %22 {offsets = [0, 256], sizes = [16, 128], strides = [1, 1]} : vector<16x384xf32> to vector<16x128xf32>
    %36 = vector.extract_strided_slice %1 {offsets = [3, 0], sizes = [1, 128], strides = [1, 1]} : vector<8x384xf32> to vector<1x128xf32>
    %37 = vector.broadcast %36 : vector<1x128xf32> to vector<16x128xf32>
    %38 = arith.mulf %28, %37 : vector<16x128xf32>
    %39 = arith.addf %35, %38 : vector<16x128xf32>
    %40 = math.tanh %39 : vector<16x128xf32>
    %cst_13 = arith.constant 1.000000e+00 : f32
    %41 = vector.broadcast %cst_13 : f32 to vector<16x128xf32>
    %42 = arith.subf %41, %34 : vector<16x128xf32>
    %43 = arith.mulf %42, %40 : vector<16x128xf32>
    %44 = arith.truncf %43 : vector<16x128xf32> to vector<16x128xbf16>
    %c416 = arith.constant 416 : index
    %c0_14 = arith.constant 0 : index
    %45 = vector.load %arg2[%c416, %c0_14] : memref<552x384xbf16, #tpu.memory_space<vmem>>, vector<128x128xbf16>
    %cst_15 = arith.constant dense<0.000000e+00> : vector<16x128xf32>
    %46 = tpu.matmul %44, %45, %cst_15 {dimension_numbers = #tpu.dot_dimension_numbers<[1], [0], [0], [1], [0, 0, 1, 1], [], []>} : vector<16x128xbf16>, vector<128x128xbf16>, vector<16x128xf32> -> vector<16x128xf32>
    %47 = vector.extract_strided_slice %1 {offsets = [4, 0], sizes = [1, 128], strides = [1, 1]} : vector<8x384xf32> to vector<1x128xf32>
    %48 = vector.broadcast %47 : vector<1x128xf32> to vector<16x128xf32>
    %49 = arith.addf %46, %48 : vector<16x128xf32>
    %cst_16 = arith.constant 0.000000e+00 : f32
    %50 = vector.broadcast %cst_16 : f32 to vector<16x128xf32>
    %51 = arith.maximumf %49, %50 : vector<16x128xf32>
    %52 = arith.truncf %51 : vector<16x128xf32> to vector<16x128xbf16>
    %c416_17 = arith.constant 416 : index
    %c128 = arith.constant 128 : index
    %53 = vector.load %arg2[%c416_17, %c128] : memref<552x384xbf16, #tpu.memory_space<vmem>>, vector<128x128xbf16>
    %cst_18 = arith.constant dense<0.000000e+00> : vector<16x128xf32>
    %54 = tpu.matmul %52, %53, %cst_18 {dimension_numbers = #tpu.dot_dimension_numbers<[1], [0], [0], [1], [0, 0, 1, 1], [], []>} : vector<16x128xbf16>, vector<128x128xbf16>, vector<16x128xf32> -> vector<16x128xf32>
    %55 = vector.extract_strided_slice %1 {offsets = [5, 0], sizes = [1, 128], strides = [1, 1]} : vector<8x384xf32> to vector<1x128xf32>
    %56 = vector.broadcast %55 : vector<1x128xf32> to vector<16x128xf32>
    %57 = arith.addf %54, %56 : vector<16x128xf32>
    %cst_19 = arith.constant 0.000000e+00 : f32
    %58 = vector.broadcast %cst_19 : f32 to vector<16x128xf32>
    %59 = arith.maximumf %57, %58 : vector<16x128xf32>
    %c544 = arith.constant 544 : index
    %c0_20 = arith.constant 0 : index
    %60 = vector.load %arg2[%c544, %c0_20] : memref<552x384xbf16, #tpu.memory_space<vmem>>, vector<8x128xbf16>
    %61 = arith.truncf %59 : vector<16x128xf32> to vector<16x128xbf16>
    %cst_21 = arith.constant dense<0.000000e+00> : vector<8x16xf32>
    %62 = tpu.matmul %60, %61, %cst_21 {dimension_numbers = #tpu.dot_dimension_numbers<[1], [1], [0], [0], [0, 0, 1, 0], [], []>} : vector<8x128xbf16>, vector<16x128xbf16>, vector<8x16xf32> -> vector<8x16xf32>
    %63 = vector.extract_strided_slice %1 {offsets = [6, 0], sizes = [1, 1], strides = [1, 1]} : vector<8x384xf32> to vector<1x1xf32>
    %64 = vector.broadcast %63 : vector<1x1xf32> to vector<8x16xf32>
    %65 = arith.addf %62, %64 : vector<8x16xf32>
    %c0_22 = arith.constant 0 : index
    %c0_23 = arith.constant 0 : index
    %66 = vector.load %arg4[%c0_22, %c0_23] : memref<8x16xf32, #tpu.memory_space<vmem>>, vector<8x16xf32>
    tpu.vector_store %arg4[%c0_22, %c0_23], %65 {strides = array<i32>} : memref<8x16xf32, #tpu.memory_space<vmem>>, vector<8x16xf32>,
    return
  }
  func.func @transform_0(%arg0: i32) -> (i32, i32) {
    %c0_i32 = arith.constant 0 : i32
    %c0_i32_0 = arith.constant 0 : i32
    return %arg0, %c0_i32 : i32, i32
  }
  func.func @transform_1(%arg0: i32) -> (i32, i32) {
    %c0_i32 = arith.constant 0 : i32
    %c0_i32_0 = arith.constant 0 : i32
    %c0_i32_1 = arith.constant 0 : i32
    return %c0_i32, %c0_i32_0 : i32, i32
  }
  func.func @transform_2(%arg0: i32) -> (i32, i32) {
    %c0_i32 = arith.constant 0 : i32
    %c0_i32_0 = arith.constant 0 : i32
    %c0_i32_1 = arith.constant 0 : i32
    return %c0_i32, %c0_i32_0 : i32, i32
  }
  func.func @transform_3(%arg0: i32) -> (i32, i32) {
    %c0_i32 = arith.constant 0 : i32
    %c0_i32_0 = arith.constant 0 : i32
    return %c0_i32, %arg0 : i32, i32
  }
}

</mosaic_0001>

<bundles_post_ra>
// kernel: jamba_forward.1
= control target key start
LH: loop header
LB: loop body
LE: loop exit
PB: predicated region body
PF: predicated region fallthrough
CT: control target
= control target key end

     0   :  { %8 = vsyncpa [#allocation3], 0  ;;  %s1178_s12 = smov [#allocation2]   ;;  %s1285_s0 = inlined_call_operand.vmem [shape: bf16[16,32], index: 0, kind: input, shape index: {}]   ;;  %s1286_s1 = inlined_call_operand.hbm [shape: bf16[552,384], index: 1, kind: input, shape index: {}]   ;;  %s1287_s2 = inlined_call_operand.vmem [shape: f32[8,384], index: 2, kind: input, shape index: {}]   ;;  %s1288_s3 = inlined_call_operand.vmem [shape: f32[8,16], index: 3, kind: output, shape index: {}]  }
   0x1   :  { %s16_s13 = sshll.u32 %s1178_s12, 4  ;;  %s1154_s16 = scalar_lea.hbm %s1286_s1, 13248  ;;  %s17_s13 = int_to_ptr.vmem [resolvable:$true] %s16_s13 }
   0x2   :  { %p1155_p0 = scmp.ne.s32.totalorder %s1286_s1, %s1154_s16  ;;  %p1158_p1 = scmp.lt.u32.totalorder %s1154_s16, %s1286_s1 }
   0x4   :  { %p1160_p2 = pnand %p1158_p1, %p1155_p0 }
   0x6   :  { %1163 = shalt.err (!%p1160_p2)
}
   0x7   :  { %s1164_s21 = scalar_lea.vmem %s17_s13, 13248  ;;  %p1169_p4 = scmp.lt.s32.totalorder %s17_s13, %s17_s13 }
   0x8   :  { %p1165_p3 = scmp.ne.s32.totalorder %s17_s13, %s1164_s21  ;;  %p1170_p5 = scmp.lt.s32.totalorder %s1164_s21, %s1164_s21 }
   0xa   :  { %p1171_p6 = por %p1170_p5, %p1169_p4 }
   0xc   :  { %p1172_p7 = pnand %p1171_p6, %p1165_p3 }
   0xe   :  { %1175 = shalt.err (!%p1172_p7)
}
   0xf   :  { %s1179_s22 = smov 192   ;;  %s1180_s23 = smov 12  }
  0x10   :  { %22 = dma.hbm_to_vmem [thread:$0]  %s1286_s1, 13248, %s17_s13, [#allocation3], %s1179_s22, %s1179_s22, %s1180_s23  }
  0x11   :  { %1176 = dma.done.wait [#allocation3], 13248  }
  0x12   :  { %1177 = vsyncadd [#allocation3], 4294954048  ;;  %v1181_v0 = vmov 0   ;;  %v1063_v1 = vld [vmem:[#allocation2 + $0x4] ss:$12 sps:$4 sm:$0xff]   ;;  %vm71_vm0 = vcmask 261120   ;;  %v38_v33 = vlaneseq }
  0x13   :  { %107 = vmatprep.mubr.bf16.mxu0 %v1181_v0  ;;  %v1065_v2 = vld [vmem:[#allocation2] ss:$12 sps:$4 sm:$0xff]   ;;  %75 = vmatprep.subr.bf16.mxu0 %v1063_v1  ;;  %v1066_v3 = vld [vmem:[#allocation2 + $0x1c] ss:$12 sps:$4 sm:$0xff]   ;;  %v1068_v4 = vld [vmem:[#allocation2 + $0x18] ss:$12 sps:$4 sm:$0xff]  }
  0x14   :  { %76 = vmatpush1.bf16.msra.mxu0 %v1065_v2  ;;  %v1069_v5 = vld [vmem:[%s1285_s0] sm:$0xff]   ;;  %v1070_v6 = vld [vmem:[#allocation2 + $0xf0] ss:$12 sps:$4 sm:$0xff]   ;;  %v1076_v12 = vld [vmem:[#allocation2 + $0x138] ss:$12 sps:$4 sm:$0xff]   ;;  %v1182_v24 = vmov 0.0  }
  0x15   :  { %77 = vmatprep.subr.bf16.mxu0 %v1066_v3  ;;  %v1071_v7 = vld [vmem:[#allocation2 + $0x30] ss:$12 sps:$4 sm:$0xff]   ;;  %938 = vmatprep.subr.bf16.mxu1 %v1070_v6  ;;  %v1072_v8 = vld [vmem:[#allocation2 + $0x108] ss:$12 sps:$4 sm:$0xff]   ;;  %v1074_v10 = vld [vmem:[#allocation2 + $0x120] ss:$12 sps:$4 sm:$0xff]  }
  0x16   :  { %939 = vmatpush3.bf16.msra.mxu1 %v1071_v7  ;;  %v1073_v9 = vld [vmem:[#allocation2 + $0x48] ss:$12 sps:$4 sm:$0xff]   ;;  %v1075_v11 = vld [vmem:[#allocation2 + $0x60] ss:$12 sps:$4 sm:$0xff]   ;;  %v1077_v13 = vld [vmem:[#allocation2 + $0x78] ss:$12 sps:$4 sm:$0xff]  }
  0x17   :  { %940 = vmatprep.subr.bf16.mxu1 %v1072_v8  ;;  %v1078_v14 = vld [vmem:[#allocation2 + $0x150] ss:$12 sps:$4 sm:$0xff]   ;;  %v1080_v16 = vld [vmem:[#allocation2 + $0x168] ss:$12 sps:$4 sm:$0xff]   ;;  %v1082_v18 = vld [vmem:[#allocation2 + $0x180] ss:$12 sps:$4 sm:$0xff]  }
  0x18   :  { %78 = vmatpush1.bf16.msra.mxu0 %v1068_v4  ;;  %v1079_v15 = vld [vmem:[#allocation2 + $0x90] ss:$12 sps:$4 sm:$0xff]   ;;  %v1081_v17 = vld [vmem:[#allocation2 + $0xa8] ss:$12 sps:$4 sm:$0xff]   ;;  %v1083_v19 = vld [vmem:[#allocation2 + $0xc0] ss:$12 sps:$4 sm:$0xff]  }
  0x19   :  { %v1084_v20 = vld [vmem:[#allocation2 + $0x198] ss:$12 sps:$4 sm:$0xff]   ;;  %v1086_v22 = vld [vmem:[#allocation2 + $0x1b0] ss:$12 sps:$4 sm:$0xff]   ;;  %v1088_v23 = vld [vmem:[#allocation2 + $0x1b4] ss:$12 sps:$4 sm:$0xff]  }
  0x1a   :  { %941 = vmatpush3.bf16.msra.mxu1 %v1073_v9  ;;  %v1085_v21 = vld [vmem:[#allocation2 + $0xd8] ss:$12 sps:$4 sm:$0xff]   ;;  %472 = vmatprep.subr.bf16.mxu0 %v1088_v23  ;;  %v1090_v26 = vld [vmem:[#allocation2 + $0x1c8] ss:$12 sps:$4 sm:$0xff]   ;;  %v1094_v28 = vld [vmem:[#allocation2 + $0x1e0] ss:$12 sps:$4 sm:$0xff]  }
  0x1b   :  { %877 = vmatmul.mubr.msk.bf16.vlgmr.msra.gmra.mrb[0].mxu0 %vm71_vm0, %v1069_v5  ;;  %942 = vmatprep.subr.bf16.mxu1 %v1074_v10  ;;  %v1092_v25 = vld [vmem:[#allocation2 + $0x1cc] ss:$12 sps:$4 sm:$0xff]   ;;  %v1096_v27 = vld [vmem:[#allocation2 + $0x1e4] ss:$12 sps:$4 sm:$0xff]   ;;  %v1100_v29 = vld [vmem:[#allocation2 + $0x1fc] ss:$12 sps:$4 sm:$0xff]  }
  0x1c   :  { %504 = vmatprep.mubr.bf16.mxu0 %v1181_v0  ;;  %473 = vmatpush1.bf16.msra.mxu0 %v1086_v22  ;;  %v1098_v30 = vld [vmem:[#allocation2 + $0x1f8] ss:$12 sps:$4 sm:$0xff]   ;;  %v1104_v31 = vld [vmem:[#allocation2 + $0x214] ss:$12 sps:$4 sm:$0xff]   ;;  %v1102_v32 = vld [vmem:[#allocation2 + $0x210] ss:$12 sps:$4 sm:$0xff]  }
  0x1d   :  { %474 = vmatprep.subr.bf16.mxu0 %v1092_v25  ;;  %v1220_v34 = vshrl.u32 %v38_v33, 7  ;;  %v1226_v36 = vld [vmem:[%s1287_s2] sm:$0xff]  ;;  %v1231_v37 = vld [vmem:[%s1287_s2 + $0x8] sm:$0xff]  ;;  %v1089_v54 = vld [vmem:[#allocation2 + $0x1b8] ss:$12 sps:$4 sm:$0xff]   ;;  %vm1183_vm1 = vmmov 0  }
  0x1e   :  { %943 = vmatpush3.bf16.msra.mxu1 %v1075_v11  ;;  %v1093_v55 = vld [vmem:[#allocation2 + $0x1d0] ss:$12 sps:$4 sm:$0xff]   ;;  %v1097_v56 = vld [vmem:[#allocation2 + $0x1e8] ss:$12 sps:$4 sm:$0xff]   ;;  %v1101_v57 = vld [vmem:[#allocation2 + $0x200] ss:$12 sps:$4 sm:$0xff]  }
  0x1f   :  { %944 = vmatprep.subr.bf16.mxu1 %v1076_v12  ;;  %v40_v35 = vsub.s32 0, %v1220_v34  ;;  %v1105_v58 = vld [vmem:[#allocation2 + $0x218] ss:$12 sps:$4 sm:$0xff]   ;;  %v1106_v60 = vld [vmem:[#allocation2 + $0x228] ss:$12 sps:$4 sm:$0xff]   ;;  %v158_v4 = vsub.s32 1, %v1220_v34 }
  0x20   :  { %475 = vmatpush1.bf16.msra.mxu0 %v1090_v26  ;;  %v1108_v59 = vld [vmem:[#allocation2 + $0x22c] ss:$12 sps:$4 sm:$0xff]   ;;  %v1109_v61 = vld [vmem:[#allocation2 + $0x230] ss:$12 sps:$4 sm:$0xff]   ;;  %v1113_v0 = vld [vmem:[#allocation2 + $0x248] ss:$12 sps:$4 sm:$0xff]  }
  0x21   :  { %476 = vmatprep.subr.bf16.mxu0 %v1096_v27  ;;  %v41_v38 = vrot.slane %v1226_v36, %v40_v35  ;;  %v45_v39 = vrot.slane %v1231_v37, %v40_v35  ;;  %v1112_v62 = vld [vmem:[#allocation2 + $0x244] ss:$12 sps:$4 sm:$0xff]   ;;  %v1110_v63 = vld [vmem:[#allocation2 + $0x240] ss:$12 sps:$4 sm:$0xff]   ;;  %v1116_v1 = vld [vmem:[#allocation2 + $0x25c] ss:$12 sps:$4 sm:$0xff]   ;;  %v159_v6 = vrot.slane %v1226_v36, %v158_v4 }
  0x22   :  { %945 = vmatpush3.bf16.msra.mxu1 %v1077_v13  ;;  %v1114_v2 = vld [vmem:[#allocation2 + $0x258] ss:$12 sps:$4 sm:$0xff]   ;;  %v1117_v3 = vld [vmem:[#allocation2 + $0x260] ss:$12 sps:$4 sm:$0xff]   ;;  %v1123_v22 = vld [vmem:[#allocation2 + $0x2e8] ss:$12 sps:$4 sm:$0xff]  }
  0x23   :  { %946 = vmatprep.subr.bf16.mxu1 %v1078_v14  ;;  %v1124_v23 = vld [vmem:[#allocation2 + $0x300] ss:$12 sps:$4 sm:$0xff]   ;;  %v1125_v25 = vld [vmem:[#allocation2 + $0x318] ss:$12 sps:$4 sm:$0xff]   ;;  %vm865_vm2 = vcmask 130048  }
  0x24   :  { %477 = vmatpush1.bf16.msra.mxu0 %v1094_v28  ;;  %v1126_v26 = vld [vmem:[#allocation2 + $0x274] ss:$12 sps:$4 sm:$0xff]   ;;  %v1127_v27 = vld [vmem:[#allocation2 + $0x28c] ss:$12 sps:$4 sm:$0xff]   ;;  %v1128_v28 = vld [vmem:[#allocation2 + $0x2a4] ss:$12 sps:$4 sm:$0xff]  }
  0x25   :  { %478 = vmatprep.subr.bf16.mxu0 %v1100_v29  ;;  %v1129_v29 = vld [vmem:[#allocation2 + $0x2bc] ss:$12 sps:$4 sm:$0xff]  }
  0x26   :  { %947 = vmatpush3.bf16.msra.mxu1 %v1079_v15 }
  0x27   :  { %948 = vmatprep.subr.bf16.mxu1 %v1080_v16 }
  0x28   :  { %479 = vmatpush1.bf16.msra.mxu0 %v1098_v30  ;;  %v1130_v30 = vld [vmem:[#allocation2 + $0x2d4] ss:$12 sps:$4 sm:$0xff]  }
  0x29   :  { %480 = vmatprep.subr.bf16.mxu0 %v1104_v31  ;;  %v1131_v31 = vld [vmem:[#allocation2 + $0x2ec] ss:$12 sps:$4 sm:$0xff]  }
  0x2a   :  { %949 = vmatpush3.bf16.msra.mxu1 %v1081_v17  ;;  %v1118_v17 = vld [vmem:[#allocation2 + $0x270] ss:$12 sps:$4 sm:$0xff]  }
  0x2b   :  { %950 = vmatprep.subr.bf16.mxu1 %v1082_v18  ;;  %v1119_v18 = vld [vmem:[#allocation2 + $0x288] ss:$12 sps:$4 sm:$0xff]  }
  0x2c   :  { %481 = vmatpush1.bf16.msra.mxu0 %v1102_v32  ;;  %v334_v32 = vsub.s32 2, %v1220_v34 }
  0x2d   :  { %482 = vmatprep.subr.bf16.mxu0 %v1108_v59  ;;  %v33_v59 = vld [vmem:[%s1287_s2 + $0x10] sm:$0xff] }
  0x2e   :  { %951 = vmatpush3.bf16.msra.mxu1 %v1083_v19  ;;  %v1120_v19 = vld [vmem:[#allocation2 + $0x2a0] ss:$12 sps:$4 sm:$0xff]   ;;  %v335_v33 = vrot.slane %v1226_v36, %v334_v32 }
  0x2f   :  { %952 = vmatprep.subr.bf16.mxu1 %v1084_v20  ;;  %v1121_v20 = vld [vmem:[#allocation2 + $0x2b8] ss:$12 sps:$4 sm:$0xff]  }
  0x30   :  { %483 = vmatpush1.bf16.msra.mxu0 %v1106_v60 }
  0x31   :  { %484 = vmatprep.subr.bf16.mxu0 %v1112_v62 }
  0x32   :  { %953 = vmatpush3.bf16.msra.mxu1 %v1085_v21  ;;  %v1122_v21 = vld [vmem:[#allocation2 + $0x2d0] ss:$12 sps:$4 sm:$0xff]  }
  0x33   :  { %989 = vmatprep.subr.bf16.mxu1 %v1182_v24 }
  0x34   :  { %485 = vmatpush1.bf16.msra.mxu0 %v1110_v63 }
  0x35   :  { %486 = vmatprep.subr.bf16.mxu0 %v1116_v1 }
  0x38   :  { %487 = vmatpush1.bf16.msra.mxu0 %v1114_v2 }
  0x39   :  { %1009 = vmatprep.subr.bf16.mxu0 %v1182_v24 }
  0xee   :  { %v109_v40 = vpop.f32.mrb[0].mxu0 }
  0xef   :  { %v110_v41 = vadd.f32 %v109_v40, %v41_v38  ;;  %v111_v42 = vpop.f32.mrb[1].mxu0 }
  0xf0   :  { %v112_v43 = vadd.f32 %v111_v42, %v45_v39  ;;  %v113_v44 = vpop.f32.mrb[2].mxu0 }
  0xf1   :  { %v114_v45 = vadd.f32 %v113_v44, %v41_v38  ;;  %v115_v46 = vpop.f32.mrb[3].mxu0  ;;  %v118_v48 = vmax.f32 %v110_v41, 0.0 }
  0xf2   :  { %v116_v47 = vadd.f32 %v115_v46, %v45_v39  ;;  %v119_v50 = vmax.f32 %v112_v43, 0.0  ;;  %v339_v39 = vrot.slane %v1231_v37, %v334_v32 }
  0xf3   :  { %v120_v49 = vmax.f32 %v114_v45, 0.0 }
  0xf4   :  { %v121_v51 = vmax.f32 %v116_v47, 0.0 }
  0xf5   :  { %v122_v52 = vpack.c.bf16 %v120_v49, %v118_v48 }
  0xf6   :  { %v123_v53 = vpack.c.bf16 %v121_v51, %v119_v50 }
  0xf8   :  { %288 = vmatprep.mubr.bf16.mxu1 %v123_v53 }
  0xf9   :  { %289 = vmatmul.mubr.bf16.vlgmr.msra.gmra.mrb[0].mxu1 %v122_v52 }
  0xfa   :  { %990 = vmatpush3.bf16.msra.mxu1 %v1089_v54  ;;  %1005 = vmatprep.mubr.msk.bf16.mxu1 %vm1183_vm1, %v1182_v24 }
  0xfb   :  { %991 = vmatprep.subr.bf16.mxu1 %v1182_v24 }
  0xfe   :  { %992 = vmatpush3.bf16.msra.mxu1 %v1093_v55 }
  0xff   :  { %993 = vmatprep.subr.bf16.mxu1 %v1182_v24 }
 0x102   :  { %994 = vmatpush3.bf16.msra.mxu1 %v1097_v56 }
 0x103   :  { %995 = vmatprep.subr.bf16.mxu1 %v1182_v24 }
 0x106   :  { %996 = vmatpush3.bf16.msra.mxu1 %v1101_v57  ;;  %v582_v57 = vsub.s32 3, %v1220_v34 }
 0x107   :  { %997 = vmatprep.subr.bf16.mxu1 %v1182_v24 }
 0x108   :  { %v583_v62 = vrot.slane %v1226_v36, %v582_v57 }
 0x10a   :  { %998 = vmatpush3.bf16.msra.mxu1 %v1105_v58 }
 0x10b   :  { %999 = vmatprep.subr.bf16.mxu1 %v1182_v24 }
 0x10e   :  { %1000 = vmatpush3.bf16.msra.mxu1 %v1109_v61  ;;  %v343_v61 = vrot.slane %v33_v59, %v334_v32  ;;  %v821_v32 = vrot.slane %v1226_v36, 6 }
 0x10f   :  { %1001 = vmatprep.subr.bf16.mxu1 %v1182_v24 }
 0x110   :  { %1055 = vpush %v821_v32 }
 0x112   :  { %1002 = vmatpush3.bf16.msra.mxu1 %v1113_v0 }
 0x113   :  { %1003 = vmatprep.subr.bf16.mxu1 %v1182_v24 }
 0x116   :  { %1004 = vmatpush3.bf16.msra.mxu1 %v1117_v3 }
 0x117   :  { %1029 = vmatprep.subr.bf16.mxu1 %v1182_v24 }
 0x141   :  { %s1056_s2 = spop %1055 }
 0x1cc   :  { %v954_v5 = vpop.f32.mrb[0].mxu1 }
 0x1cd   :  { %v955_v7 = vpop.f32.mrb[1].mxu1 }
 0x1ce   :  { %v956_v8 = vadd.f32 %v955_v7, %v954_v5  ;;  %v957_v9 = vpop.f32.mrb[2].mxu1 }
 0x1cf   :  { %v958_v10 = vpop.f32.mrb[3].mxu1 }
 0x1d0   :  { %v291_v11 = vadd.f32 %v956_v8, %v159_v6  ;;  %v959_v12 = vadd.f32 %v958_v10, %v957_v9 }
 0x1d2   :  { %v294_v13 = vadd.f32 %v959_v12, %v159_v6  ;;  %v297_v14 = vmax.f32 %v291_v11, 0.0 }
 0x1d4   :  { %v298_v15 = vmax.f32 %v294_v13, 0.0 }
 0x1d6   :  { %v299_v16 = vpack.c.bf16 %v298_v15, %v297_v14 }
 0x1d8   :  { %505 = vmatmul.mubr.bf16.vlgmr.msra.gmra.mrb[4].mxu0 %v299_v16  ;;  %1006 = vmatmul.mubr.bf16.vlgmr.msra.gmra.mrb[4].mxu1 %v299_v16 }
 0x1d9   :  { %1025 = vmatprep.mubr.msk.bf16.mxu0 %vm1183_vm1, %v1182_v24  ;;  %1045 = vmatprep.mubr.msk.bf16.mxu1 %vm1183_vm1, %v1182_v24 }
 0x1da   :  { %1010 = vmatpush3.bf16.msra.mxu0 %v1118_v17  ;;  %1030 = vmatpush3.bf16.msra.mxu1 %v1126_v26 }
 0x1db   :  { %1011 = vmatprep.subr.bf16.mxu0 %v1182_v24  ;;  %1031 = vmatprep.subr.bf16.mxu1 %v1182_v24 }
 0x1de   :  { %1012 = vmatpush3.bf16.msra.mxu0 %v1119_v18  ;;  %1032 = vmatpush3.bf16.msra.mxu1 %v1127_v27  ;;  %v1132_v18 = vld [vmem:[#allocation2 + $0x304] ss:$12 sps:$4 sm:$0xff]  }
 0x1df   :  { %1013 = vmatprep.subr.bf16.mxu0 %v1182_v24  ;;  %1033 = vmatprep.subr.bf16.mxu1 %v1182_v24 }
 0x1e2   :  { %1014 = vmatpush3.bf16.msra.mxu0 %v1120_v19  ;;  %1034 = vmatpush3.bf16.msra.mxu1 %v1128_v28  ;;  %v1133_v19 = vld [vmem:[#allocation2 + $0x31c] ss:$12 sps:$4 sm:$0xff]  }
 0x1e3   :  { %1015 = vmatprep.subr.bf16.mxu0 %v1182_v24  ;;  %1035 = vmatprep.subr.bf16.mxu1 %v1182_v24 }
 0x1e6   :  { %1016 = vmatpush3.bf16.msra.mxu0 %v1121_v20  ;;  %1036 = vmatpush3.bf16.msra.mxu1 %v1129_v29  ;;  %v613_v20 = vsub.s32 4, %v1220_v34 }
 0x1e7   :  { %1017 = vmatprep.subr.bf16.mxu0 %v1182_v24  ;;  %1037 = vmatprep.subr.bf16.mxu1 %v1182_v24 }
 0x1ea   :  { %1018 = vmatpush3.bf16.msra.mxu0 %v1122_v21  ;;  %1038 = vmatpush3.bf16.msra.mxu1 %v1130_v30  ;;  %v614_v21 = vrot.slane %v1226_v36, %v613_v20 }
 0x1eb   :  { %1019 = vmatprep.subr.bf16.mxu0 %v1182_v24  ;;  %1039 = vmatprep.subr.bf16.mxu1 %v1182_v24 }
 0x1ee   :  { %1020 = vmatpush3.bf16.msra.mxu0 %v1123_v22  ;;  %1040 = vmatpush3.bf16.msra.mxu1 %v1131_v31 }
 0x1ef   :  { %1021 = vmatprep.subr.bf16.mxu0 %v1182_v24  ;;  %1041 = vmatprep.subr.bf16.mxu1 %v1182_v24 }
 0x1f2   :  { %1022 = vmatpush3.bf16.msra.mxu0 %v1124_v23  ;;  %1042 = vmatpush3.bf16.msra.mxu1 %v1132_v18 }
 0x1f3   :  { %1023 = vmatprep.subr.bf16.mxu0 %v1182_v24  ;;  %1043 = vmatprep.subr.bf16.mxu1 %v1182_v24 }
 0x1f6   :  { %1024 = vmatpush3.bf16.msra.mxu0 %v1125_v25  ;;  %1044 = vmatpush3.bf16.msra.mxu1 %v1133_v19 }
 0x1f7   :  { %1049 = vmatprep.subr.bf16.mxu0 %v1182_v24 }
 0x2ab   :  { %v506_v35 = vpop.f32.mrb[4].mxu0  ;;  %v549_v38 = vpop.f32.mrb[4].mxu1 }
 0x2ac   :  { %v507_v40 = vadd.f32 %v506_v35, %v335_v33  ;;  %v508_v41 = vpop.f32.mrb[5].mxu0  ;;  %v1007_v42 = vpop.f32.mrb[5].mxu1  ;;  %v550_v2 = vadd.f32 %v549_v38, %v343_v61 }
 0x2ad   :  { %v510_v43 = vpop.f32.mrb[6].mxu0  ;;  %v552_v44 = vpop.f32.mrb[6].mxu1  ;;  %v509_v49 = vadd.f32 %v508_v41, %v339_v39 }
 0x2ae   :  { %v918_v45 = vmul.f32 -1.442695, %v507_v40  ;;  %v511_v46 = vadd.f32 %v510_v43, %v335_v33  ;;  %v512_v47 = vpop.f32.mrb[7].mxu0  ;;  %v1008_v48 = vpop.f32.mrb[7].mxu1  ;;  %v553_v6 = vadd.f32 %v552_v44, %v343_v61 }
 0x2af   :  { %v513_v51 = vadd.f32 %v512_v47, %v339_v39  ;;  %v920_v52 = vmul.f32 -1.442695, %v509_v49  ;;  %v823_v47 = vstv %s1056_s2 }
 0x2b0   :  { %1134 = vpow2.f32 %v918_v45  ;;  %v919_v50 = vmul.f32 -1.442695, %v511_v46  ;;  %v818_v46 = vld [vmem:[#allocation2 + $0x330] sm:$0xf] }
 0x2b1   :  { %v921_v53 = vmul.f32 -1.442695, %v513_v51 }
 0x2b2   :  { %1136 = vpow2.f32 %v919_v50 }
 0x2b3   :  { %1138 = vpow2.f32 %v920_v52 }
 0x2b4   :  { %1140 = vpow2.f32 %v921_v53 }
 0x2ba   :  { %v1135_v54 = vpop.eup %1134 }
 0x2bb   :  { %v562_v37 = vadd.f32 1.0, %v1135_v54 }
 0x2bc   :  { %v1137_v55 = vpop.eup %1136 }
 0x2bd   :  { %1142 = vrcp.f32 %v562_v37  ;;  %v563_v56 = vadd.f32 1.0, %v1137_v55  ;;  %v1139_v58 = vpop.eup %1138 }
 0x2be   :  { %v1141_v60 = vpop.eup %1140  ;;  %v574_v63 = vadd.f32 1.0, %v1139_v58 }
 0x2bf   :  { %1144 = vrcp.f32 %v563_v56  ;;  %v575_v0 = vadd.f32 1.0, %v1141_v60 }
 0x2c0   :  { %1146 = vrcp.f32 %v574_v63 }
 0x2c1   :  { %1148 = vrcp.f32 %v575_v0 }
 0x2c7   :  { %v1143_v1 = vpop.eup %1142 }
 0x2c8   :  { %v584_v3 = vmul.f32 %v1143_v1, %v583_v62 }
 0x2c9   :  { %v1145_v4 = vpop.eup %1144 }
 0x2ca   :  { %v586_v5 = vadd.f32 %v584_v3, %v550_v2  ;;  %v585_v7 = vmul.f32 %v1145_v4, %v583_v62  ;;  %v1147_v9 = vpop.eup %1146 }
 0x2cb   :  { %v1149_v10 = vpop.eup %1148  ;;  %v590_v11 = vsub.f32 1.0, %v1147_v9 }
 0x2cc   :  { %1150 = vtanh.f32 %v586_v5  ;;  %v587_v8 = vadd.f32 %v585_v7, %v553_v6  ;;  %v591_v13 = vsub.f32 1.0, %v1149_v10 }
 0x2ce   :  { %1152 = vtanh.f32 %v587_v8 }
 0x2d6   :  { %v1151_v12 = vpop.eup %1150 }
 0x2d7   :  { %v592_v14 = vmul.f32 %v1151_v12, %v590_v11 }
 0x2d8   :  { %v1153_v15 = vpop.eup %1152 }
 0x2d9   :  { %v593_v16 = vmul.f32 %v1153_v15, %v591_v13 }
 0x2db   :  { %v594_v17 = vpack.c.bf16 %v593_v16, %v592_v14 }
 0x2dd   :  { %1026 = vmatmul.mubr.bf16.vlgmr.msra.gmra.mrb[8].mxu0 %v594_v17 }
 0x2de   :  { %1051 = vmatprep.mubr.msk.bf16.mxu0 %vm1183_vm1, %v1182_v24  ;;  %v725_v24 = vsub.s32 5, %v1220_v34 }
 0x2e0   :  { %v726_v33 = vrot.slane %v1226_v36, %v725_v24 }
 0x3b0   :  { %v697_v22 = vpop.f32.mrb[8].mxu0 }
 0x3b1   :  { %v698_v23 = vadd.f32 %v697_v22, %v614_v21  ;;  %v1027_v25 = vpop.f32.mrb[9].mxu0 }
 0x3b2   :  { %v700_v26 = vpop.f32.mrb[10].mxu0 }
 0x3b3   :  { %v701_v27 = vadd.f32 %v700_v26, %v614_v21  ;;  %v1028_v28 = vpop.f32.mrb[11].mxu0  ;;  %v704_v29 = vmax.f32 %v698_v23, 0.0 }
 0x3b5   :  { %v705_v30 = vmax.f32 %v701_v27, 0.0 }
 0x3b7   :  { %v706_v31 = vpack.c.bf16 %v705_v30, %v704_v29 }
 0x3b9   :  { %1046 = vmatmul.mubr.bf16.vlgmr.msra.gmra.mrb[8].mxu1 %v706_v31 }
 0x48c   :  { %v809_v35 = vpop.f32.mrb[8].mxu1 }
 0x48d   :  { %v810_v38 = vadd.f32 %v809_v35, %v726_v33  ;;  %v1047_v39 = vpop.f32.mrb[9].mxu1 }
 0x48e   :  { %v812_v40 = vpop.f32.mrb[10].mxu1 }
 0x48f   :  { %v813_v41 = vadd.f32 %v812_v40, %v726_v33  ;;  %v1048_v42 = vpop.f32.mrb[11].mxu1  ;;  %v816_v43 = vmax.f32 %v810_v38, 0.0 }
 0x491   :  { %v817_v44 = vmax.f32 %v813_v41, 0.0 }
 0x493   :  { %v819_v45 = vpack.c.bf16 %v817_v44, %v816_v43 }
 0x495   :  { %1050 = vmatpush3.bf16.xpose.msra.mxu0 %v819_v45 }
 0x49c   :  { %1052 = vmatmul.mubr.bf16.vlgmr.msra.gmra.mrb[12].mxu0 %v818_v46 }
 0x56f   :  { %v859_v48 = vpop.f32.mrb[12].mxu0 }
 0x570   :  { %v860_v49 = vadd.f32 %v859_v48, %v823_v47  ;;  %v1053_v34 = vpop.f32.mrb[13].mxu0 }
 0x571   :  { %v862_v50 = vpop.f32.mrb[14].mxu0 }
 0x572   :  { %866 = vst.msk [vmem:[%s1288_s3] sm:$0xff] %vm865_vm2, %v860_v49  ;;  %v1054_v36 = vpop.f32.mrb[15].mxu0 }
 0x573   :  { %871 = vsyncpa [#allocation3], 1 }

</bundles_post_ra>
